<compile_context>
chip_gen: v6e
topology: v6e:2x2x1
jax: 0.10.0
libtpu: 0.0.40
codegen_flags: <defaults>
</compile_context>

<pallas_src>
import jax
import jax.numpy as jnp
from jax.experimental import pallas as pl
from jax.experimental.pallas import tpu as pltpu

BN_EPS = 1e-5


def _round_up(a, b):
    return -(-a // b) * b


# ----------------------------------------------------------------------------
# Kernels
# ----------------------------------------------------------------------------
def _stats_kernel(x_ref, wt_ref, sum_ref, sqsum_ref):
    """Pass 1: per-channel sum / sum-of-squares of the (ReLU -> 1x1 conv) output."""
    @pl.when(pl.program_id(0) == 0)
    def _init():
        sum_ref[...] = jnp.zeros_like(sum_ref)
        sqsum_ref[...] = jnp.zeros_like(sqsum_ref)

    a = jnp.maximum(x_ref[...], 0)                                        # ReLU (bf16)
    y = jnp.dot(wt_ref[...], a, preferred_element_type=jnp.float32)      # (C_out, TP) f32
    sum_ref[...] += jnp.sum(y, axis=1, keepdims=True)
    sqsum_ref[...] += jnp.sum(y * y, axis=1, keepdims=True)


def _normalize_kernel(x_ref, wt_ref, scale_ref, bias_ref, o_ref):
    """Pass 2: recompute the cheap 1x1 conv and apply folded BN scale/bias."""
    a = jnp.maximum(x_ref[...], 0)
    y = jnp.dot(wt_ref[...], a, preferred_element_type=jnp.float32)
    o_ref[...] = (y * scale_ref[...] + bias_ref[...]).astype(o_ref.dtype)


# ----------------------------------------------------------------------------
# Wrapper
# ----------------------------------------------------------------------------
def _pick_tile_p(p, k, c_out, in_bytes):
    """Lane tile over P (multiple of 128), sized so double-buffered in/out blocks fit
    a conservative 8 MiB budget (safe on v5e 16 MiB scoped, v6e, v7x 32/64 MiB)."""
    budget = 8 * 1024 * 1024

    def need(t):
        # 2x buffered x block + 2x buffered out block + resident weight/scale/bias
        return 2 * t * (k * in_bytes + c_out * 4) + c_out * k * in_bytes + 64 * c_out

    tile = 2048
    while tile > 128 and need(tile) > budget:
        tile //= 2
    tile = min(tile, _round_up(p, 128))
    return tile, need(tile)


def factorized_reduce(x, weights, gamma, beta, stride, *, compute_dtype=jnp.bfloat16):
    """x: (N, C_in, H, W) f32; weights: list of (C_in, c_out_i) 1x1-conv kernels."""
    n, c_in, h, w = x.shape
    nb = len(weights)
    c_outs = [int(wk.shape[1]) for wk in weights]
    c_out = sum(c_outs)
    ho = (h - 1) // stride + 1
    wo = (w - 1) // stride + 1
    k = nb * c_in
    p = n * ho * wo

    # ---- wrapper layout glue: one pad, nb strided views, one channel stack ----
    # ReLU commutes with the zero pad (relu(0)=0), so it is applied in-kernel.
    xp = jnp.pad(x, ((0, 0), (0, 0), (0, stride - 1), (0, stride - 1)))
    views = [xp[:, :, i::stride, i::stride][:, :, :ho, :wo] for i in range(nb)]
    slab = jnp.stack(views, axis=0)                      # (nb, N, C_in, Ho, Wo)
    slab = slab.transpose(0, 2, 1, 3, 4).reshape(k, p).astype(compute_dtype)
    # TODO(synk): the shift/stride subsample + transpose still costs one HBM relayout
    # pass; it could be folded into the kernel with strided DMA on a padded NHWC array.

    in_bytes = jnp.dtype(compute_dtype).itemsize
    tile_p, vmem_need = _pick_tile_p(p, k, c_out, in_bytes)
    p_pad = _round_up(p, tile_p)
    if p_pad != p:
        # zero rows contribute 0 to sum/sumsq; stats divide by the true count p.
        slab = jnp.pad(slab, ((0, 0), (0, p_pad - p)))
    num_tiles = p_pad // tile_p

    # Block-diagonal transposed weight: one matmul == concat of per-branch convs.
    wt = jnp.zeros((c_out, k), dtype=compute_dtype)
    off = 0
    for i, wk in enumerate(weights):                     # wk: (C_in, c_out_i)
        wt = wt.at[off:off + c_outs[i], i * c_in:(i + 1) * c_in].set(
            wk.T.astype(compute_dtype))
        off += c_outs[i]

    vmem_limit = int(min(48 * 2**20, max(16 * 2**20, 4 * vmem_need)))
    matmul_flops = 2 * p_pad * k * c_out
    slab_bytes = p_pad * k * in_bytes
    wt_bytes = c_out * k * in_bytes

    x_spec = pl.BlockSpec((k, tile_p), lambda t: (0, t))
    w_spec = pl.BlockSpec((c_out, k), lambda t: (0, 0))
    vec_spec = pl.BlockSpec((c_out, 1), lambda t: (0, 0))

    # ---- pass 1: per-channel sum / sum-of-squares -----------------------------
    sums, sqsums = pl.pallas_call(
        _stats_kernel,
        grid=(num_tiles,),
        in_specs=[x_spec, w_spec],
        out_specs=[vec_spec, vec_spec],
        out_shape=[jax.ShapeDtypeStruct((c_out, 1), jnp.float32),
                   jax.ShapeDtypeStruct((c_out, 1), jnp.float32)],
        compiler_params=pltpu.CompilerParams(
            dimension_semantics=("arbitrary",),          # accumulation over P
            vmem_limit_bytes=vmem_limit),
        cost_estimate=pl.CostEstimate(
            flops=matmul_flops, transcendentals=0,
            bytes_accessed=slab_bytes + wt_bytes + 2 * c_out * 4),
    )(slab, wt)

    # ---- fold BN (training-mode batch stats, biased var) into scale/bias ------
    gamma32 = gamma.astype(jnp.float32)
    beta32 = beta.astype(jnp.float32)
    mean = sums[:, 0] / p
    var = jnp.maximum(sqsums[:, 0] / p - mean * mean, 0.0)
    inv = jax.lax.rsqrt(var + BN_EPS)
    scale = (gamma32 * inv).reshape(c_out, 1)
    bias = (beta32 - mean * gamma32 * inv).reshape(c_out, 1)
    # TODO(synk): PyTorch training-mode BN also updates running_mean/running_var
    # buffers (stateful side effect that does not affect the forward output) - omitted.

    # ---- pass 2: recompute 1x1 conv and normalize tile-by-tile ----------------
    out_cp = pl.pallas_call(
        _normalize_kernel,
        grid=(num_tiles,),
        in_specs=[x_spec, w_spec, vec_spec, vec_spec],
        out_specs=pl.BlockSpec((c_out, tile_p), lambda t: (0, t)),
        out_shape=jax.ShapeDtypeStruct((c_out, p_pad), jnp.float32),
        compiler_params=pltpu.CompilerParams(
            dimension_semantics=("parallel",),           # independent tiles (2 TCs on v7x)
            vmem_limit_bytes=vmem_limit),
        cost_estimate=pl.CostEstimate(
            flops=matmul_flops + 2 * p_pad * c_out, transcendentals=0,
            bytes_accessed=slab_bytes + wt_bytes + p_pad * c_out * 4),
    )(slab, wt, scale, bias)

    # (C_out, P) -> NCHW
    return out_cp[:, :p].reshape(c_out, n, ho, wo).transpose(1, 0, 2, 3)


# ----------------------------------------------------------------------------
# Module-level API (Skip)
# ----------------------------------------------------------------------------
def init_skip_params(key, in_channels, out_channels, stride):
    if stride == 1:
        return {}
    if stride == 2:
        c_outs = [out_channels // 2, out_channels - out_channels // 2]
    elif stride == 4:
        assert out_channels % 4 == 0, f'C_out : {out_channels}'
        c_outs = [out_channels // 4] * 4
    else:
        raise ValueError(f'Invalid stride : {stride}')
    keys = jax.random.split(key, len(c_outs))
    weights = []
    for kk, co in zip(keys, c_outs):
        # nn.Conv2d(C_in, co, 1, stride, bias=False) weight (co, C_in, 1, 1),
        # stored pre-transposed/squeezed as (C_in, co) for the in-kernel matmul.
        weights.append(0.1 * jax.random.normal(kk, (in_channels, co), dtype=jnp.float32))
    gamma = jnp.ones((out_channels,), jnp.float32)    # BatchNorm2d affine init
    beta = jnp.zeros((out_channels,), jnp.float32)
    return {'weights': weights, 'gamma': gamma, 'beta': beta}


def skip_forward(x, params, stride, *, compute_dtype=jnp.bfloat16):
    if stride == 1:
        return x  # nn.Identity: no compute
    return factorized_reduce(x, params['weights'], params['gamma'], params['beta'],
                             stride, compute_dtype=compute_dtype)


# ----------------------------------------------------------------------------
# Pure-JAX reference (training-mode BN) for the self-test
# ----------------------------------------------------------------------------
def _reference(x, weights, gamma, beta, stride):
    n, c, h, w = x.shape
    ho = (h - 1) // stride + 1
    wo = (w - 1) // stride + 1
    xr = jnp.maximum(x, 0.0)
    xp = jnp.pad(xr, ((0, 0), (0, 0), (0, stride - 1), (0, stride - 1)))
    outs = []
    for i, wk in enumerate(weights):
        z = xp[:, :, i::stride, i::stride][:, :, :ho, :wo]
        outs.append(jnp.einsum('nchw,co->nohw', z, wk))
    out = jnp.concatenate(outs, axis=1)
    mean = out.mean(axis=(0, 2, 3), keepdims=True)
    var = ((out - mean) ** 2).mean(axis=(0, 2, 3), keepdims=True)
    return ((out - mean) / jnp.sqrt(var + BN_EPS)) * gamma.reshape(1, -1, 1, 1) \
        + beta.reshape(1, -1, 1, 1)


if __name__ == "__main__":
    key = jax.random.PRNGKey(0)
    kx, kp = jax.random.split(key)

    in_channels, out_channels = 4, 8
    x = jax.random.normal(kx, (2, in_channels, 16, 16), dtype=jnp.float32)

    # stride=1 path: nn.Identity
    y_id = skip_forward(x, {}, 1)
    assert y_id.shape == x.shape

    # stride=2 and stride=4 FactorizedReduce paths
    for stride in (2, 4):
        params = init_skip_params(jax.random.fold_in(kp, stride),
                                  in_channels, out_channels, stride)
        y = jax.block_until_ready(skip_forward(x, params, stride))
        ho = (16 - 1) // stride + 1
        assert y.shape == (2, out_channels, ho, ho), y.shape

        # Reference on bf16-rounded inputs/weights (kernel computes in bf16 with f32
        # accumulation), so the comparison isolates kernel correctness.
        xq = x.astype(jnp.bfloat16).astype(jnp.float32)
        wq = [wk.astype(jnp.bfloat16).astype(jnp.float32) for wk in params['weights']]
        ref = _reference(xq, wq, params['gamma'], params['beta'], stride)
        err = float(jnp.max(jnp.abs(y - ref)))
        assert jnp.allclose(y, ref, atol=2e-3, rtol=2e-3), (stride, err)

    print("KERNEL_OK")
</pallas_src>

<mosaic_0001>
module attributes {stable_mosaic.version = 11 : i64} {
  func.func @_stats_kernel(%arg0: i32, %arg1: memref<8x128xbf16, #tpu.memory_space<vmem>>, %arg2: memref<8x8xbf16, #tpu.memory_space<vmem>>, %arg3: memref<8x1xf32, #tpu.memory_space<vmem>>, %arg4: memref<8x1xf32, #tpu.memory_space<vmem>>) attributes {dimension_semantics = [#tpu.dimension_semantics<arbitrary>], iteration_bounds = array<i64: 1>, scalar_prefetch = 0 : i64, scratch_operands = 0 : i64, tpu.core_type = #tpu.core_type<tc>, window_params = [{transform_indices = @transform_0, window_bounds = array<i64: 8, 128>}, {pipeline_mode = #tpu.pipeline_mode<synchronous>, transform_indices = @transform_1, window_bounds = array<i64: 8, 8>}, {pipeline_mode = #tpu.pipeline_mode<synchronous>, transform_indices = @transform_2, window_bounds = array<i64: 8, 1>}, {pipeline_mode = #tpu.pipeline_mode<synchronous>, transform_indices = @transform_3, window_bounds = array<i64: 8, 1>}]} {
    %c0_i32 = arith.constant 0 : i32
    %0 = arith.cmpi eq, %arg0, %c0_i32 : i32
    %1 = arith.extui %0 : i1 to i32
    %c0_i32_0 = arith.constant 0 : i32
    %2 = arith.cmpi ne, %1, %c0_i32_0 : i32
    scf.if %2 {
      %cst_15 = arith.constant 0.000000e+00 : f32
      %19 = vector.broadcast %cst_15 : f32 to vector<8x1xf32>
      %c0_16 = arith.constant 0 : index
      %c0_17 = arith.constant 0 : index
      %20 = vector.load %arg3[%c0_16, %c0_17] : memref<8x1xf32, #tpu.memory_space<vmem>>, vector<8x1xf32>
      tpu.vector_store %arg3[%c0_16, %c0_17], %19 {strides = array<i32>} : memref<8x1xf32, #tpu.memory_space<vmem>>, vector<8x1xf32>,
      %cst_18 = arith.constant 0.000000e+00 : f32
      %21 = vector.broadcast %cst_18 : f32 to vector<8x1xf32>
      %c0_19 = arith.constant 0 : index
      %c0_20 = arith.constant 0 : index
      %22 = vector.load %arg4[%c0_19, %c0_20] : memref<8x1xf32, #tpu.memory_space<vmem>>, vector<8x1xf32>
      tpu.vector_store %arg4[%c0_19, %c0_20], %21 {strides = array<i32>} : memref<8x1xf32, #tpu.memory_space<vmem>>, vector<8x1xf32>,
    } else {
    }
    %c0 = arith.constant 0 : index
    %c0_1 = arith.constant 0 : index
    %3 = vector.load %arg1[%c0, %c0_1] : memref<8x128xbf16, #tpu.memory_space<vmem>>, vector<8x128xbf16>
    %cst = arith.constant 0.000000e+00 : bf16
    %4 = vector.broadcast %cst : bf16 to vector<8x128xbf16>
    %5 = arith.maximumf %3, %4 : vector<8x128xbf16>
    %c0_2 = arith.constant 0 : index
    %c0_3 = arith.constant 0 : index
    %6 = vector.load %arg2[%c0_2, %c0_3] : memref<8x8xbf16, #tpu.memory_space<vmem>>, vector<8x8xbf16>
    %cst_4 = arith.constant dense<0.000000e+00> : vector<8x128xf32>
    %7 = tpu.matmul %6, %5, %cst_4 {dimension_numbers = #tpu.dot_dimension_numbers<[1], [0], [0], [1], [0, 0, 1, 1], [], []>} : vector<8x8xbf16>, vector<8x128xbf16>, vector<8x128xf32> -> vector<8x128xf32>
    %c0_5 = arith.constant 0 : index
    %c0_6 = arith.constant 0 : index
    %8 = vector.load %arg3[%c0_5, %c0_6] : memref<8x1xf32, #tpu.memory_space<vmem>>, vector<8x1xf32>
    %cst_7 = arith.constant dense<0.000000e+00> : vector<8xf32>
    %9 = vector.multi_reduction <add>, %7, %cst_7 [1] : vector<8x128xf32> to vector<8xf32>
    %10 = vector.shape_cast %9 : vector<8xf32> to vector<8x1xf32>
    %11 = arith.addf %8, %10 : vector<8x1xf32>
    %c0_8 = arith.constant 0 : index
    %c0_9 = arith.constant 0 : index
    %12 = vector.load %arg3[%c0_8, %c0_9] : memref<8x1xf32, #tpu.memory_space<vmem>>, vector<8x1xf32>
    tpu.vector_store %arg3[%c0_8, %c0_9], %11 {strides = array<i32>} : memref<8x1xf32, #tpu.memory_space<vmem>>, vector<8x1xf32>,
    %c0_10 = arith.constant 0 : index
    %c0_11 = arith.constant 0 : index
    %13 = vector.load %arg4[%c0_10, %c0_11] : memref<8x1xf32, #tpu.memory_space<vmem>>, vector<8x1xf32>
    %14 = arith.mulf %7, %7 : vector<8x128xf32>
    %cst_12 = arith.constant dense<0.000000e+00> : vector<8xf32>
    %15 = vector.multi_reduction <add>, %14, %cst_12 [1] : vector<8x128xf32> to vector<8xf32>
    %16 = vector.shape_cast %15 : vector<8xf32> to vector<8x1xf32>
    %17 = arith.addf %13, %16 : vector<8x1xf32>
    %c0_13 = arith.constant 0 : index
    %c0_14 = arith.constant 0 : index
    %18 = vector.load %arg4[%c0_13, %c0_14] : memref<8x1xf32, #tpu.memory_space<vmem>>, vector<8x1xf32>
    tpu.vector_store %arg4[%c0_13, %c0_14], %17 {strides = array<i32>} : memref<8x1xf32, #tpu.memory_space<vmem>>, vector<8x1xf32>,
    return
  }
  func.func @transform_0(%arg0: i32) -> (i32, i32) {
    %c0_i32 = arith.constant 0 : i32
    %c0_i32_0 = arith.constant 0 : i32
    return %c0_i32, %arg0 : i32, i32
  }
  func.func @transform_1(%arg0: i32) -> (i32, i32) {
    %c0_i32 = arith.constant 0 : i32
    %c0_i32_0 = arith.constant 0 : i32
    %c0_i32_1 = arith.constant 0 : i32
    return %c0_i32, %c0_i32_0 : i32, i32
  }
  func.func @transform_2(%arg0: i32) -> (i32, i32) {
    %c0_i32 = arith.constant 0 : i32
    %c0_i32_0 = arith.constant 0 : i32
    %c0_i32_1 = arith.constant 0 : i32
    return %c0_i32, %c0_i32_0 : i32, i32
  }
  func.func @transform_3(%arg0: i32) -> (i32, i32) {
    %c0_i32 = arith.constant 0 : i32
    %c0_i32_0 = arith.constant 0 : i32
    %c0_i32_1 = arith.constant 0 : i32
    return %c0_i32, %c0_i32_0 : i32, i32
  }
}

</mosaic_0001>

<bundles_post_ra>
// kernel: tpu_custom_call.1
= control target key start
LH: loop header
LB: loop body
LE: loop exit
PB: predicated region body
PF: predicated region fallthrough
CT: control target
= control target key end

     0   :  { %9 = vsyncpa [#allocation3], 0  ;;  %s229_s0 = inlined_call_operand.hbm [shape: bf16[8,128], index: 0, kind: input, shape index: {}]   ;;  %s230_s1 = inlined_call_operand.hbm [shape: bf16[8,8], index: 1, kind: input, shape index: {}]   ;;  %s231_s2 = inlined_call_operand.vmem [shape: f32[8,1], index: 2, kind: output, shape index: {0}]   ;;  %s232_s3 = inlined_call_operand.vmem [shape: f32[8,1], index: 3, kind: output, shape index: {1}]  }
   0x1   :  { %10 = vsyncpa [#allocation5], 0  ;;  %s176_s12 = smov [#allocation2]   ;;  %s177_s14 = smov [#allocation4]  }
   0x2   :  { %s17_s13 = sshll.u32 %s176_s12, 4  ;;  %s27_s15 = sshll.u32 %s177_s14, 4  ;;  %s18_s13 = int_to_ptr.vmem [resolvable:$true] %s17_s13  ;;  %s28_s15 = int_to_ptr.vmem [resolvable:$true] %s27_s15 }
   0x3   :  { %s140_s16 = scalar_lea.vmem %s18_s13, 64  ;;  %p145_p1 = scmp.lt.s32.totalorder %s18_s13, %s18_s13 }
   0x4   :  { %p141_p0 = scmp.ne.s32.totalorder %s18_s13, %s140_s16  ;;  %p146_p2 = scmp.lt.s32.totalorder %s140_s16, %s140_s16 }
   0x6   :  { %p147_p3 = por %p146_p2, %p145_p1 }
   0x8   :  { %p148_p4 = pnand %p147_p3, %p141_p0 }
   0xa   :  { %151 = shalt.err (!%p148_p4)
}
   0xb   :  { %20 = dma.hbm_to_vmem [thread:$0]  %s229_s0, 64, %s18_s13, [#allocation3]  }
   0xc   :  { %s160_s19 = scalar_lea.vmem %s28_s15, 64  ;;  %p165_p6 = scmp.lt.s32.totalorder %s28_s15, %s28_s15 }
   0xd   :  { %p161_p5 = scmp.ne.s32.totalorder %s28_s15, %s160_s19  ;;  %p166_p7 = scmp.lt.s32.totalorder %s160_s19, %s160_s19 }
   0xf   :  { %p167_p8 = por %p166_p7, %p165_p6 }
  0x11   :  { %p168_p9 = pnand %p167_p8, %p161_p5 }
  0x13   :  { %171 = shalt.err (!%p168_p9)
}
  0x14   :  { %30 = dma.hbm_to_vmem [thread:$0]  %s230_s1, 64, %s28_s15, [#allocation5]  }
  0x15   :  { %172 = dma.done.wait [#allocation3], 64  }
  0x16   :  { %173 = vsyncadd [#allocation3], 4294967232 }
  0x17   :  { %174 = dma.done.wait [#allocation5], 64  }
  0x18   :  { %175 = vsyncadd [#allocation5], 4294967232  ;;  %vm42_vm0 = vcmask 7168   ;;  %v178_v0 = vmov 0.0   ;;  %vm179_vm1 = vmmov 0   ;;  %vm52_vm2 = vcmask 1043456  }
  0x19   :  { %43 = vst.msk [vmem:[%s231_s2] sm:$0xff] %vm42_vm0, %v178_v0  ;;  %44 = vst.msk [vmem:[%s232_s3] sm:$0xff] %vm42_vm0, %v178_v0  ;;  %121 = vmatprep.subr.bf16.mxu0 %v178_v0  ;;  %123 = vmatprep.mubr.msk.bf16.mxu0 %vm179_vm1, %v178_v0  ;;  %v45_v1 = vld [vmem:[#allocation2] sm:$0xf]  ;;  %v180_v2 = vmov 0   ;;  %vm48_vm3 = vcmask 64512  }
  0x1a   :  { %v46_v3 = vmax.bf16 %v180_v2, %v45_v1  ;;  %v47_v5 = vld [vmem:[#allocation4] sm:$0xf] }
  0x1c   :  { %v54_v4 = vsel %vm52_vm2, %v46_v3, 0 }
  0x1d   :  { %122 = vmatpush3.bf16.msra.mxu0 %v54_v4 }
  0x20   :  { %124 = vmatmul.mubr.msk.bf16.vlgmr.msra.gmra.mxu0 %vm48_vm3, %v47_v5  ;;  %v96_v11 = vld [vmem:[%s231_s2] sm:$0xff] }
  0x21   :  { %v102_v14 = vld [vmem:[%s232_s3] sm:$0xff] }
  0xe0   :  { %v90_v6 = vpop.f32.mrf.mxu0 }
  0xe1   :  { %97 = vadd.xlane.f32.xlu0 %v90_v6  ;;  %v103_v8 = vmul.f32 %v90_v6, %v90_v6 }
  0xe2   :  { %v125_v7 = vpop.f32.mrf.mxu0 }
  0xe4   :  { %v93_v9 = vpop.f32.mrf.mxu0 }
  0xe5   :  { %104 = vadd.xlane.f32.xlu0 %v103_v8 }
  0xe6   :  { %v126_v10 = vpop.f32.mrf.mxu0 }
 0x16a   :  { %v98_v12 = vpop.xlane.xlu0 %97 }
 0x16b   :  { %v99_v13 = vadd.f32 %v98_v12, %v96_v11 }
 0x16d   :  { %101 = vst.msk [vmem:[%s231_s2] sm:$0xff] %vm42_vm0, %v99_v13 }
 0x16e   :  { %v105_v15 = vpop.xlane.xlu0 %104 }
 0x16f   :  { %v106_v16 = vadd.f32 %v105_v15, %v102_v14 }
 0x171   :  { %107 = vst.msk [vmem:[%s232_s3] sm:$0xff] %vm42_vm0, %v106_v16 }
 0x172   :  { %116 = vsyncpa [#allocation3], 1 }
 0x173   :  { %117 = vsyncpa [#allocation5], 1 }

</bundles_post_ra>
